<compile_context>
chip_gen: v6e
topology: v6e:2x2x1
jax: 0.10.0
libtpu: 0.0.40
codegen_flags: <defaults>
</compile_context>

<pallas_src>
import functools

import jax
import jax.numpy as jnp
from jax.experimental import pallas as pl
from jax.experimental.pallas import tpu as pltpu


# -----------------------------------------------------------------------------
# Small helpers
# -----------------------------------------------------------------------------
def _round_up(x, m):
    return ((x + m - 1) // m) * m


def _pick_block(total, candidates=(1024, 512, 256, 128, 64, 32, 16, 8)):
    """Largest candidate (multiple of 8) that divides `total`; else the full dim."""
    for c in candidates:
        if c <= total and total % c == 0:
            return c
    return total


# -----------------------------------------------------------------------------
# Kernel 1: fused LoRALinear   y = x @ W^T + ((x @ Wd^T) @ Wu^T) * (alpha / r)
# Weights arrive pre-transposed from the wrapper: Wt=[in,out], Wdt=[in,r],
# Wut=[r,out]  ->  no in-kernel transposes, lane-dense d_out output.
# -----------------------------------------------------------------------------
def _lora_linear_kernel(x_ref, wt_ref, wdt_ref, wut_ref, o_ref, *, scaling):
    x = x_ref[...]
    base = jnp.dot(x, wt_ref[...], preferred_element_type=jnp.float32)
    down = jnp.dot(x, wdt_ref[...], preferred_element_type=jnp.float32)
    up = jnp.dot(down.astype(x.dtype), wut_ref[...],
                 preferred_element_type=jnp.float32)
    o_ref[...] = (base + up * scaling).astype(o_ref.dtype)


def lora_linear(x, w, w_down, w_up, *, alpha, r, block_rows=256):
    """x: [N, in], w: [out, in], w_down: [r, in], w_up: [out, r]."""
    n, d_in = x.shape
    d_out = w.shape[0]
    scaling = float(alpha) / float(r)

    # Large row tiles; tail handled by zero-padding N (sliced off at the end).
    bn = min(block_rows, _round_up(n, 8))
    n_pad = _round_up(n, bn)
    x_in = jnp.pad(x, ((0, n_pad - n), (0, 0))) if n_pad != n else x

    # Pre-transpose once in XLA (layout plumbing, not per-step XLU work).
    wt = w.T          # [in, out]
    wdt = w_down.T    # [in, r]
    wut = w_up.T      # [r, out]

    # NOTE: for production hidden sizes (>=2048) the weight should be tiled
    # over d_out / K with a VMEM accumulator so it fits v7x's 64 MiB VMEM;
    # at this module's small hidden size a fully resident weight is optimal.
    kernel = functools.partial(_lora_linear_kernel, scaling=scaling)
    out = pl.pallas_call(
        kernel,
        out_shape=jax.ShapeDtypeStruct((n_pad, d_out), x.dtype),
        grid=(n_pad // bn,),
        in_specs=[
            pl.BlockSpec((bn, d_in), lambda i: (i, 0)),
            pl.BlockSpec((d_in, d_out), lambda i: (0, 0)),
            pl.BlockSpec((d_in, r), lambda i: (0, 0)),
            pl.BlockSpec((r, d_out), lambda i: (0, 0)),
        ],
        out_specs=pl.BlockSpec((bn, d_out), lambda i: (i, 0)),
        compiler_params=pltpu.CompilerParams(
            dimension_semantics=("parallel",)),
    )(x_in, wt, wdt, wut)
    return out[:n] if n_pad != n else out


# -----------------------------------------------------------------------------
# Kernel 2: diffusion input assembly  cat([grid (- identity)], conf*2 - 1, dim=C)
# Channel slice-writes (no concatenate copy); last dim = H*W (lane-dense).
# -----------------------------------------------------------------------------
def _flow_conf_concat_kernel(grid_ref, conf_ref, o_ref):
    o_ref[:, 0:2] = grid_ref[...].astype(o_ref.dtype)
    o_ref[:, 2:3] = (conf_ref[...] * 2.0 - 1.0).astype(o_ref.dtype)


def _flow_conf_concat_res_kernel(grid_ref, conf_ref, ident_ref, o_ref):
    o_ref[:, 0:2] = (grid_ref[...] - ident_ref[...]).astype(o_ref.dtype)
    o_ref[:, 2:3] = (conf_ref[...] * 2.0 - 1.0).astype(o_ref.dtype)


def flow_conf_concat(vid_grid, vid_conf, ident_grid=None, *, residual=False):
    """vid_grid: [B,2,nf,H,W], vid_conf: [B,1,nf,H,W] -> [B,3,nf,H,W]."""
    b, _, nf, h, w = vid_grid.shape
    hw = h * w
    g4 = vid_grid.reshape(b, 2, nf, hw)
    c4 = vid_conf.reshape(b, 1, nf, hw)

    tf = _pick_block(nf, (8,))                               # frames per tile
    hb = _pick_block(hw, (2048, 1024, 512, 256, 128))        # lane-dense chunk
    grid = (b, nf // tf, hw // hb)

    g_spec = pl.BlockSpec((1, 2, tf, hb), lambda i, j, k: (i, 0, j, k))
    c_spec = pl.BlockSpec((1, 1, tf, hb), lambda i, j, k: (i, 0, j, k))
    o_spec = pl.BlockSpec((1, 3, tf, hb), lambda i, j, k: (i, 0, j, k))
    params = pltpu.CompilerParams(
        dimension_semantics=("parallel", "parallel", "parallel"))
    out_shape = jax.ShapeDtypeStruct((b, 3, nf, hw), vid_grid.dtype)

    if residual:
        # Identity grid only shipped on the residual path (one batch slice —
        # it is identical across B).
        i4 = ident_grid[:1].reshape(1, 2, nf, hw)
        i_spec = pl.BlockSpec((1, 2, tf, hb), lambda i, j, k: (0, 0, j, k))
        out = pl.pallas_call(
            _flow_conf_concat_res_kernel,
            out_shape=out_shape, grid=grid,
            in_specs=[g_spec, c_spec, i_spec], out_specs=o_spec,
            compiler_params=params,
        )(g4, c4, i4)
    else:
        out = pl.pallas_call(
            _flow_conf_concat_kernel,
            out_shape=out_shape, grid=grid,
            in_specs=[g_spec, c_spec], out_specs=o_spec,
            compiler_params=params,
        )(g4, c4)
    return out.reshape(b, 3, nf, h, w)


# -----------------------------------------------------------------------------
# Kernel 3: elementwise affine  y = x * scale + shift   (used for (x+1)*0.5)
# Lane-dense (-1, 128) layout + row-tiled grid.
# -----------------------------------------------------------------------------
def _affine_kernel(x_ref, o_ref, *, scale, shift):
    o_ref[...] = (x_ref[...] * scale + shift).astype(o_ref.dtype)


def affine(x, scale, shift):
    shape = x.shape
    total = x.size
    lane = 128 if total % 128 == 0 else shape[-1]
    x2 = x.reshape(-1, lane)
    rows = x2.shape[0]
    bn = _pick_block(rows)
    kernel = functools.partial(_affine_kernel, scale=float(scale),
                               shift=float(shift))
    out = pl.pallas_call(
        kernel,
        out_shape=jax.ShapeDtypeStruct(x2.shape, x.dtype),
        grid=(rows // bn,),
        in_specs=[pl.BlockSpec((bn, lane), lambda i: (i, 0))],
        out_specs=pl.BlockSpec((bn, lane), lambda i: (i, 0)),
        compiler_params=pltpu.CompilerParams(
            dimension_semantics=("parallel",)),
    )(x2)
    return out.reshape(shape)


# -----------------------------------------------------------------------------
# Kernel 4: fused dual L1 loss
#   rec = mean(|real - fake_out|),  rec_warp = mean(|real - fake_warped|)
# One pass over real_vid (read once), accumulator outputs across an
# "arbitrary" reduction grid axis, init/finalize with pl.when.
# -----------------------------------------------------------------------------
def _dual_l1_kernel(real_ref, a_ref, b_ref, o1_ref, o2_ref, *, inv_n):
    @pl.when(pl.program_id(0) == 0)
    def _():
        o1_ref[...] = jnp.zeros_like(o1_ref)
        o2_ref[...] = jnp.zeros_like(o2_ref)

    r = real_ref[...].astype(jnp.float32)
    a = a_ref[...].astype(jnp.float32)
    c = b_ref[...].astype(jnp.float32)
    o1_ref[...] += jnp.sum(jnp.abs(r - a)) * inv_n
    o2_ref[...] += jnp.sum(jnp.abs(r - c)) * inv_n


def dual_l1_loss(real, fake_a, fake_b):
    total = real.size
    lane = 128 if total % 128 == 0 else real.shape[-1]
    r2 = real.reshape(-1, lane)
    a2 = fake_a.reshape(-1, lane)
    b2 = fake_b.reshape(-1, lane)
    rows = r2.shape[0]
    bn = _pick_block(rows)
    kernel = functools.partial(_dual_l1_kernel, inv_n=1.0 / float(total))
    in_spec = pl.BlockSpec((bn, lane), lambda i: (i, 0))
    out1, out2 = pl.pallas_call(
        kernel,
        out_shape=(jax.ShapeDtypeStruct((1, 1), jnp.float32),
                   jax.ShapeDtypeStruct((1, 1), jnp.float32)),
        grid=(rows // bn,),
        in_specs=[in_spec, in_spec, in_spec],
        out_specs=(pl.BlockSpec((1, 1), lambda i: (0, 0)),
                   pl.BlockSpec((1, 1), lambda i: (0, 0))),
        compiler_params=pltpu.CompilerParams(
            dimension_semantics=("arbitrary",)),
    )(r2, a2, b2)
    return out1[0, 0], out2[0, 0]


# -----------------------------------------------------------------------------
# Glue (plain JAX): identity sampling grid, exactly FlowDiffusion.get_grid
# -----------------------------------------------------------------------------
def get_grid(b, nf, h, w):
    h_range = jnp.linspace(-1.0, 1.0, h)
    w_range = jnp.linspace(-1.0, 1.0, w)
    hh, ww = jnp.meshgrid(h_range, w_range, indexing="ij")   # [H,W]
    # torch: stack([h,w],-1).flip(3).permute(0,3,1,2) -> channel 0 = w, 1 = h
    grid = jnp.stack([ww, hh], axis=0)                        # [2,H,W]
    grid = jnp.broadcast_to(grid[None, :, None], (b, 2, nf, h, w))
    return grid.astype(jnp.float32)


# -----------------------------------------------------------------------------
# FlowDiffusion forward (the tensor math defined in this module)
# -----------------------------------------------------------------------------
class FlowDiffusionPallas:
    def __init__(self, hidden=32, r=4, alpha=8.0, use_residual_flow=False,
                 key=jax.random.PRNGKey(0)):
        self.r = r
        self.alpha = alpha
        self.use_residual_flow = use_residual_flow
        k0, k1, k2 = jax.random.split(key, 3)
        # LoRALinear params (as injected by replace_linear_with_lora(r=4, alpha=8))
        self.w = (0.02 * jax.random.normal(k0, (hidden, hidden))).astype(jnp.float32)
        self.wd = (0.02 * jax.random.normal(k1, (r, hidden))).astype(jnp.float32)
        self.wu = (0.02 * jax.random.normal(k2, (hidden, r))).astype(jnp.float32)

    def forward(self, real_vid, real_vid_grid, real_vid_conf,
                pred_x0, fake_out_vid, fake_warped_vid, text_emb):
        b, _, nf, h, w = real_vid.shape

        # LoRA-adapted linear on the text-conditioning embedding (the layer
        # this module makes trainable inside the UNet).
        n_tok = text_emb.shape[0] * text_emb.shape[1]
        lora_out = lora_linear(text_emb.reshape(n_tok, -1),
                               self.w, self.wd, self.wu,
                               alpha=self.alpha, r=self.r).reshape(text_emb.shape)

        # Diffusion input:  cat((grid [- identity]), conf*2 - 1, dim=1)
        if self.use_residual_flow:
            ident = get_grid(b, nf, h, w)
            x_cond = flow_conf_concat(real_vid_grid, real_vid_conf, ident,
                                      residual=True)
            fake_vid_grid = pred_x0[:, :2] + ident
        else:
            x_cond = flow_conf_concat(real_vid_grid, real_vid_conf,
                                      residual=False)
            fake_vid_grid = pred_x0[:, :2]
        # TODO(synk): self.diffusion(x_cond, ref_img_fea, ref_text) — GaussianDiffusion /
        # Unet3D are external pretrained networks (not defined in this file); pred_x0 is
        # supplied as an input instead.

        fake_vid_conf = affine(pred_x0[:, 2:3], 0.5, 0.5)     # (x + 1) * 0.5

        # TODO(synk): generator.forward_with_flow warping — external pretrained network;
        # fake_out_vid / fake_warped_vid are supplied as inputs instead.

        rec_loss, rec_warp_loss = dual_l1_loss(real_vid, fake_out_vid,
                                               fake_warped_vid)

        return dict(lora_out=lora_out, x_cond=x_cond,
                    fake_vid_grid=fake_vid_grid, fake_vid_conf=fake_vid_conf,
                    rec_loss=rec_loss, rec_warp_loss=rec_warp_loss)


# -----------------------------------------------------------------------------
if __name__ == "__main__":
    key = jax.random.PRNGKey(0)
    ks = jax.random.split(key, 8)

    B, C, NF, H, W = 2, 3, 8, 16, 16
    HIDDEN, SEQ = 32, 8

    real_vid = jax.random.normal(ks[0], (B, C, NF, H, W), jnp.float32)
    real_vid_grid = jax.random.normal(ks[1], (B, 2, NF, H, W), jnp.float32)
    real_vid_conf = jax.random.uniform(ks[2], (B, 1, NF, H, W), jnp.float32)
    pred_x0 = jax.random.normal(ks[3], (B, 3, NF, H, W), jnp.float32)
    fake_out_vid = jax.random.normal(ks[4], (B, C, NF, H, W), jnp.float32)
    fake_warped_vid = jax.random.normal(ks[5], (B, C, NF, H, W), jnp.float32)
    text_emb = jax.random.normal(ks[6], (B, SEQ, HIDDEN), jnp.float32)

    model = FlowDiffusionPallas(hidden=HIDDEN, r=4, alpha=8.0,
                                use_residual_flow=False, key=ks[7])
    out = model.forward(real_vid, real_vid_grid, real_vid_conf,
                        pred_x0, fake_out_vid, fake_warped_vid, text_emb)
    out = jax.tree_util.tree_map(jax.block_until_ready, out)

    # ---- reference checks (plain JAX) ----
    x2 = text_emb.reshape(-1, HIDDEN)
    ref_lora = (x2 @ model.w.T
                + (x2 @ model.wd.T) @ model.wu.T * (model.alpha / model.r)
                ).reshape(text_emb.shape)
    ref_xcond = jnp.concatenate([real_vid_grid, real_vid_conf * 2.0 - 1.0], axis=1)
    ref_conf = (pred_x0[:, 2:3] + 1.0) * 0.5
    ref_rec = jnp.mean(jnp.abs(real_vid - fake_out_vid))
    ref_warp = jnp.mean(jnp.abs(real_vid - fake_warped_vid))

    assert jnp.allclose(out["lora_out"], ref_lora, atol=1e-5, rtol=1e-5)
    assert jnp.allclose(out["x_cond"], ref_xcond, atol=1e-6)
    assert jnp.allclose(out["fake_vid_conf"], ref_conf, atol=1e-6)
    assert jnp.allclose(out["rec_loss"], ref_rec, atol=1e-5, rtol=1e-5)
    assert jnp.allclose(out["rec_warp_loss"], ref_warp, atol=1e-5, rtol=1e-5)

    print("KERNEL_OK")
</pallas_src>

<mosaic_0001>
module attributes {stable_mosaic.version = 11 : i64} {
  func.func @_lora_linear_kernel(%arg0: i32, %arg1: memref<16x32xf32, #tpu.memory_space<vmem>>, %arg2: memref<32x32xf32, #tpu.memory_space<vmem>>, %arg3: memref<32x4xf32, #tpu.memory_space<vmem>>, %arg4: memref<4x32xf32, #tpu.memory_space<vmem>>, %arg5: memref<16x32xf32, #tpu.memory_space<vmem>>) attributes {dimension_semantics = [#tpu.dimension_semantics<parallel>], iteration_bounds = array<i64: 1>, scalar_prefetch = 0 : i64, scratch_operands = 0 : i64, tpu.core_type = #tpu.core_type<tc>, window_params = [{transform_indices = @transform_0, window_bounds = array<i64: 16, 32>}, {pipeline_mode = #tpu.pipeline_mode<synchronous>, transform_indices = @transform_1, window_bounds = array<i64: 32, 32>}, {pipeline_mode = #tpu.pipeline_mode<synchronous>, transform_indices = @transform_2, window_bounds = array<i64: 32, 4>}, {pipeline_mode = #tpu.pipeline_mode<synchronous>, transform_indices = @transform_3, window_bounds = array<i64: 4, 32>}, {transform_indices = @transform_4, window_bounds = array<i64: 16, 32>}]} {
    %c0 = arith.constant 0 : index
    %c0_0 = arith.constant 0 : index
    %0 = vector.load %arg1[%c0, %c0_0] : memref<16x32xf32, #tpu.memory_space<vmem>>, vector<16x32xf32>
    %c0_1 = arith.constant 0 : index
    %c0_2 = arith.constant 0 : index
    %1 = vector.load %arg2[%c0_1, %c0_2] : memref<32x32xf32, #tpu.memory_space<vmem>>, vector<32x32xf32>
    %cst = arith.constant dense<0.000000e+00> : vector<16x32xf32>
    %2 = tpu.matmul %0, %1, %cst {dimension_numbers = #tpu.dot_dimension_numbers<[1], [0], [0], [1], [0, 0, 1, 1], [], []>} : vector<16x32xf32>, vector<32x32xf32>, vector<16x32xf32> -> vector<16x32xf32>
    %c0_3 = arith.constant 0 : index
    %c0_4 = arith.constant 0 : index
    %3 = vector.load %arg3[%c0_3, %c0_4] : memref<32x4xf32, #tpu.memory_space<vmem>>, vector<32x4xf32>
    %cst_5 = arith.constant dense<0.000000e+00> : vector<16x4xf32>
    %4 = tpu.matmul %0, %3, %cst_5 {dimension_numbers = #tpu.dot_dimension_numbers<[1], [0], [0], [1], [0, 0, 1, 1], [], []>} : vector<16x32xf32>, vector<32x4xf32>, vector<16x4xf32> -> vector<16x4xf32>
    %c0_6 = arith.constant 0 : index
    %c0_7 = arith.constant 0 : index
    %5 = vector.load %arg4[%c0_6, %c0_7] : memref<4x32xf32, #tpu.memory_space<vmem>>, vector<4x32xf32>
    %cst_8 = arith.constant dense<0.000000e+00> : vector<16x32xf32>
    %6 = tpu.matmul %4, %5, %cst_8 {dimension_numbers = #tpu.dot_dimension_numbers<[1], [0], [0], [1], [0, 0, 1, 1], [], []>} : vector<16x4xf32>, vector<4x32xf32>, vector<16x32xf32> -> vector<16x32xf32>
    %cst_9 = arith.constant 2.000000e+00 : f32
    %7 = vector.broadcast %cst_9 : f32 to vector<16x32xf32>
    %8 = arith.mulf %6, %7 : vector<16x32xf32>
    %9 = arith.addf %2, %8 : vector<16x32xf32>
    %c0_10 = arith.constant 0 : index
    %c0_11 = arith.constant 0 : index
    %10 = vector.load %arg5[%c0_10, %c0_11] : memref<16x32xf32, #tpu.memory_space<vmem>>, vector<16x32xf32>
    tpu.vector_store %arg5[%c0_10, %c0_11], %9 {strides = array<i32>} : memref<16x32xf32, #tpu.memory_space<vmem>>, vector<16x32xf32>,
    return
  }
  func.func @transform_0(%arg0: i32) -> (i32, i32) {
    %c0_i32 = arith.constant 0 : i32
    %c0_i32_0 = arith.constant 0 : i32
    return %arg0, %c0_i32 : i32, i32
  }
  func.func @transform_1(%arg0: i32) -> (i32, i32) {
    %c0_i32 = arith.constant 0 : i32
    %c0_i32_0 = arith.constant 0 : i32
    %c0_i32_1 = arith.constant 0 : i32
    return %c0_i32, %c0_i32_0 : i32, i32
  }
  func.func @transform_2(%arg0: i32) -> (i32, i32) {
    %c0_i32 = arith.constant 0 : i32
    %c0_i32_0 = arith.constant 0 : i32
    %c0_i32_1 = arith.constant 0 : i32
    return %c0_i32, %c0_i32_0 : i32, i32
  }
  func.func @transform_3(%arg0: i32) -> (i32, i32) {
    %c0_i32 = arith.constant 0 : i32
    %c0_i32_0 = arith.constant 0 : i32
    %c0_i32_1 = arith.constant 0 : i32
    return %c0_i32, %c0_i32_0 : i32, i32
  }
  func.func @transform_4(%arg0: i32) -> (i32, i32) {
    %c0_i32 = arith.constant 0 : i32
    %c0_i32_0 = arith.constant 0 : i32
    return %arg0, %c0_i32 : i32, i32
  }
}

</mosaic_0001>

<bundles_post_ra>
// kernel: tpu_custom_call.1
= control target key start
LH: loop header
LB: loop body
LE: loop exit
PB: predicated region body
PF: predicated region fallthrough
CT: control target
= control target key end

     0   :  { %9 = vsyncpa [#allocation3], 0  ;;  %s478_s0 = inlined_call_operand.hbm [shape: f32[16,32], index: 0, kind: input, shape index: {}]   ;;  %s479_s1 = inlined_call_operand.vmem [shape: f32[32,32], index: 1, kind: input, shape index: {}]   ;;  %s480_s2 = inlined_call_operand.vmem [shape: f32[32,4], index: 2, kind: input, shape index: {}]   ;;  %s481_s3 = inlined_call_operand.vmem [shape: f32[4,32], index: 3, kind: input, shape index: {}]   ;;  %s482_s4 = inlined_call_operand.hbm [shape: f32[16,32], index: 4, kind: output, shape index: {}]  }
   0x1   :  { %10 = vsyncpa [#allocation4], 0  ;;  %s404_s15 = smov [#allocation2]  }
   0x2   :  { %s16_s16 = sshll.u32 %s404_s15, 4  ;;  %s17_s16 = int_to_ptr.vmem [resolvable:$true] %s16_s16 }
   0x3   :  { %s368_s17 = scalar_lea.vmem %s17_s16, 256  ;;  %p373_p1 = scmp.lt.s32.totalorder %s17_s16, %s17_s16 }
   0x4   :  { %p369_p0 = scmp.ne.s32.totalorder %s17_s16, %s368_s17  ;;  %p374_p2 = scmp.lt.s32.totalorder %s368_s17, %s368_s17 }
   0x6   :  { %p375_p3 = por %p374_p2, %p373_p1 }
   0x8   :  { %p376_p4 = pnand %p375_p3, %p369_p0 }
   0xa   :  { %379 = shalt.err (!%p376_p4)
}
   0xb   :  { %s405_s18 = smov 128   ;;  %s406_s19 = smov 8  }
   0xc   :  { %22 = dma.hbm_to_vmem [thread:$0]  %s478_s0, 256, %s17_s16, [#allocation3], %s405_s18, %s405_s18, %s406_s19  }
   0xd   :  { %400 = dma.done.wait [#allocation3], 256  }
   0xe   :  { %401 = vsyncadd [#allocation3], 4294967040  ;;  %vm42_vm0 = vcmask 261120   ;;  %v41_v0 = vld [vmem:[%s480_s2 + $0x18] sm:$0xff]  ;;  %v40_v1 = vld [vmem:[%s480_s2 + $0x10] sm:$0xff]  ;;  %vm132_vm1 = vcmask 1043456  }
   0xf   :  { %329 = vmatprep.subr.mxu0 %v41_v0  ;;  %v32_v2 = vld [vmem:[#allocation2] sm:$0xff]  ;;  %v39_v3 = vld [vmem:[%s480_s2 + $0x8] sm:$0xff]  ;;  %v37_v7 = vld [vmem:[%s479_s1 + $0x18] sm:$0xff]  ;;  %vm125_vm2 = vcmask 31744   ;;  %s407_s11 = smov [#allocation5]  }
  0x10   :  { %330 = vmatpush3.msra.mxu0 %v41_v0  ;;  %337 = vmatprep.mubr.msk.f32.mxu0 %vm42_vm0, %v32_v2  ;;  %v38_v4 = vld [vmem:[%s480_s2] sm:$0xff]  ;;  %v33_v5 = vld [vmem:[#allocation2 + $0x8] sm:$0xff]  ;;  %v36_v10 = vld [vmem:[%s479_s1 + $0x10] sm:$0xff]  ;;  %s295_s12 = sshll.u32 %s407_s11, 4  ;;  %s296_s12 = int_to_ptr.vmem [resolvable:$true] %s295_s12 }
  0x11   :  { %331 = vmatprep.subr.mxu0 %v40_v1  ;;  %v124_v6 = vld [vmem:[%s481_s3] sm:$0xf]  ;;  %v35_v11 = vld [vmem:[%s479_s1 + $0x8] sm:$0xff]  ;;  %p385_p6 = scmp.lt.s32.totalorder %s296_s12, %s296_s12 }
  0x12   :  { %332 = vmatpush3.msra.mxu0 %v40_v1  ;;  %340 = vmatprep.subr.msk.mxu1 %vm132_vm1, %v124_v6  ;;  %v34_v12 = vld [vmem:[%s479_s1] sm:$0xff]  ;;  %s380_s1 = scalar_lea.vmem %s296_s12, 256 }
  0x13   :  { %333 = vmatprep.subr.mxu0 %v39_v3  ;;  %341 = vmatpush3.msk.msra.mxu1 %vm132_vm1, %v124_v6  ;;  %p381_p5 = scmp.ne.s32.totalorder %s296_s12, %s380_s1  ;;  %p386_p7 = scmp.lt.s32.totalorder %s380_s1, %s380_s1 }
  0x14   :  { %334 = vmatpush3.msra.mxu0 %v39_v3  ;;  %345 = vmatprep.subr.mxu1 %v37_v7 }
  0x15   :  { %335 = vmatprep.subr.mxu0 %v38_v4  ;;  %p387_p8 = por %p386_p7, %p385_p6 }
  0x16   :  { %336 = vmatpush3.msra.mxu0 %v38_v4 }
  0x17   :  { %338 = vmatmul.mubr.msk.f32.vlgmr.msra.gmra.mxu0 %vm42_vm0, %v33_v5  ;;  %p388_p9 = pnand %p387_p8, %p381_p5 }
  0xd7   :  { %v339_v8 = vpop.f32.mrf.mxu0 }
  0xd9   :  { %v115_v9 = vpop.f32.mrf.mxu0 }
  0xda   :  { %342 = vmatprep.mubr.msk.f32.mxu1 %vm125_vm2, %v115_v9 }
  0xdb   :  { %343 = vmatmul.mubr.msk.f32.vlgmr.msra.gmra.mxu1 %vm125_vm2, %v339_v8 }
  0xdc   :  { %346 = vmatpush3.msra.mxu1 %v37_v7  ;;  %353 = vmatprep.mubr.msk.f32.mxu1 %vm42_vm0, %v32_v2 }
  0xdd   :  { %347 = vmatprep.subr.mxu1 %v36_v10 }
  0xde   :  { %348 = vmatpush3.msra.mxu1 %v36_v10 }
  0xdf   :  { %349 = vmatprep.subr.mxu1 %v35_v11 }
  0xe0   :  { %350 = vmatpush3.msra.mxu1 %v35_v11 }
  0xe1   :  { %351 = vmatprep.subr.mxu1 %v34_v12 }
  0xe2   :  { %352 = vmatpush3.msra.mxu1 %v34_v12 }
  0xe3   :  { %354 = vmatmul.mubr.msk.f32.vlgmr.msra.gmra.mxu1 %vm42_vm0, %v33_v5 }
 0x19b   :  { %v344_v13 = vpop.f32.mrf.mxu1 }
 0x19c   :  { %v212_v15 = vmul.f32 2.0, %v344_v13 }
 0x19d   :  { %v202_v14 = vpop.f32.mrf.mxu1 }
 0x19e   :  { %v211_v17 = vmul.f32 2.0, %v202_v14 }
 0x1a3   :  { %v355_v16 = vpop.f32.mrf.mxu1 }
 0x1a4   :  { %v285_v18 = vadd.f32 %v355_v16, %v212_v15 }
 0x1a5   :  { %v279_v19 = vpop.f32.mrf.mxu1 }
 0x1a6   :  { %289 = vst.msk [vmem:[#allocation5 + $0x8] sm:$0xff] %vm42_vm0, %v285_v18  ;;  %v280_v20 = vadd.f32 %v279_v19, %v211_v17 }
 0x1a8   :  { %288 = vst.msk [vmem:[#allocation5] sm:$0xff] %vm42_vm0, %v280_v20 }
 0x1a9   :  { %391 = shalt.err (!%p388_p9)
}
 0x1aa   :  { %301 = dma.vmem_to_hbm [thread:$0]  %s296_s12, 256, %s482_s4, [#allocation4], %s405_s18, %s405_s18, %s406_s19  }
 0x1ab   :  { %402 = dma.done.wait [#allocation4], 256  }
 0x1ac   :  { %403 = vsyncadd [#allocation4], 4294967040 }
 0x1ad   :  { %305 = vsyncpa [#allocation3], 1 }
 0x1ae   :  { %306 = vsyncpa [#allocation4], 1 }

</bundles_post_ra>
